<compile_context>
chip_gen: v7x
topology: tpu7x:2x2x1
jax: 0.10.0
libtpu: 0.0.40
codegen_flags: <defaults>
</compile_context>

<pallas_src>
import jax
import jax.numpy as jnp
from jax.experimental import pallas as pl
from jax.experimental.pallas import tpu as pltpu


_LANE_CANDIDATES = (2048, 1024, 512, 256, 128)   # multiples of the 128-lane vreg width
_TARGET_TILE_BYTES = 2 * 1024 * 1024             # ~2 MiB/block; x2 (in+out) x2 (dbl buf) = 8 MiB


def _copy_kernel(x_ref, o_ref):
    # Elementwise identity: exactly reproduces IdealSensor.forward semantics.
    o_ref[...] = x_ref[...]


def ideal_sensor_forward(img: jax.Array) -> jax.Array:
    """IdealSensor.forward: returns img unchanged (shape/dtype preserved).

    Args:
        img: (B, C, H, W) array (PyTorch NCHW convention).

    Returns:
        (B, C, H, W) array identical to the input.
    """
    orig_shape = img.shape
    dtype = img.dtype
    itemsize = jnp.dtype(dtype).itemsize
    n = img.size

    if n == 0:
        return img

    # ---- lane-dense 2D retile: (rows, lanes) -------------------------------
    lanes = None
    for cand in _LANE_CANDIDATES:
        if n % cand == 0:
            lanes = cand
            break

    if lanes is None:
        # Ragged element count (not a multiple of 128): pad once to 128 lanes.
        lanes = 128
        rows = pl.cdiv(n, lanes)
        padded_n = rows * lanes
        x2d = jnp.pad(img.reshape(-1), (0, padded_n - n)).reshape(rows, lanes)
        ragged = True
    else:
        rows = n // lanes
        x2d = img.reshape(rows, lanes)
        ragged = False

    # Row tile sized for ~2 MiB per block (multiple of 8 sublanes), clamped to
    # the full row extent for small inputs (block == full dim is always legal).
    block_rows = max(8, (_TARGET_TILE_BYTES // (lanes * itemsize)) // 8 * 8)
    block_rows = min(block_rows, rows)
    grid_rows = pl.cdiv(rows, block_rows)   # Pallas clips the ragged last block

    out2d = pl.pallas_call(
        _copy_kernel,
        out_shape=jax.ShapeDtypeStruct((rows, lanes), dtype),
        grid=(grid_rows,),
        in_specs=[pl.BlockSpec((block_rows, lanes), lambda i: (i, 0))],
        out_specs=pl.BlockSpec((block_rows, lanes), lambda i: (i, 0)),
        compiler_params=pltpu.CompilerParams(
            dimension_semantics=("parallel",),
        ),
        cost_estimate=pl.CostEstimate(
            flops=0,
            transcendentals=0,
            bytes_accessed=2 * rows * lanes * itemsize,
        ),
    )(x2d)

    if ragged:
        return out2d.reshape(-1)[:n].reshape(orig_shape)
    return out2d.reshape(orig_shape)


# TODO(synk): base-class Sensor.forward (simu_noise + BlackLevelCompensation ISP)
# is never executed on IdealSensor's forward path (it overrides forward to be
# identity), so only the identity forward is implemented here.


if __name__ == "__main__":
    key = jax.random.PRNGKey(0)
    B, C, H, W = 2, 3, 16, 16  # (B, 3, H, W) per the module docstring
    # Range roughly [black_level, 2**bit - 1] like a raw 10-bit image.
    img = jax.random.uniform(
        key, (B, C, H, W), dtype=jnp.float32, minval=64.0, maxval=1023.0
    )

    out = ideal_sensor_forward(img)
    out = jax.block_until_ready(out)

    assert out.shape == img.shape and out.dtype == img.dtype
    assert bool(jnp.all(out == img))
    print("KERNEL_OK")
</pallas_src>

<mosaic_0001>
module attributes {stable_mosaic.version = 11 : i64} {
  func.func @_copy_kernel(%arg0: i32, %arg1: memref<3x512xf32, #tpu.memory_space<vmem>>, %arg2: memref<3x512xf32, #tpu.memory_space<vmem>>) attributes {dimension_semantics = [#tpu.dimension_semantics<parallel>], iteration_bounds = array<i64: 1>, scalar_prefetch = 0 : i64, scratch_operands = 0 : i64, tpu.core_type = #tpu.core_type<tc>, window_params = [{transform_indices = @transform_0, window_bounds = array<i64: 3, 512>}, {transform_indices = @transform_1, window_bounds = array<i64: 3, 512>}]} {
    %c0 = arith.constant 0 : index
    %c0_0 = arith.constant 0 : index
    %0 = vector.load %arg1[%c0, %c0_0] : memref<3x512xf32, #tpu.memory_space<vmem>>, vector<3x512xf32>
    %c0_1 = arith.constant 0 : index
    %c0_2 = arith.constant 0 : index
    %1 = vector.load %arg2[%c0_1, %c0_2] : memref<3x512xf32, #tpu.memory_space<vmem>>, vector<3x512xf32>
    tpu.vector_store %arg2[%c0_1, %c0_2], %0 {strides = array<i32>} : memref<3x512xf32, #tpu.memory_space<vmem>>, vector<3x512xf32>,
    return
  }
  func.func @transform_0(%arg0: i32) -> (i32, i32) {
    %c0_i32 = arith.constant 0 : i32
    %c0_i32_0 = arith.constant 0 : i32
    return %arg0, %c0_i32 : i32, i32
  }
  func.func @transform_1(%arg0: i32) -> (i32, i32) {
    %c0_i32 = arith.constant 0 : i32
    %c0_i32_0 = arith.constant 0 : i32
    return %arg0, %c0_i32 : i32, i32
  }
}

</mosaic_0001>

<bundles_post_ra>
// kernel: tpu_custom_call.1
= control target key start
LH: loop header
LB: loop body
LE: loop exit
PB: predicated region body
PF: predicated region fallthrough
CT: control target
= control target key end

     0   :  { %6 = vsyncpa [#allocation3], 0  ;;  %s126_s0 = inlined_call_operand.hbm [shape: f32[3,512], index: 0, kind: input, shape index: {}]   ;;  %s127_s1 = inlined_call_operand.hbm [shape: f32[3,512], index: 1, kind: output, shape index: {}]  }
   0x1   :  { %7 = vsyncpa [#allocation4], 0  ;;  %s90_s6 = smov [#allocation2]   ;;  %s42_s10 = scalar_lea.hbm %s126_s0, 256 }
   0x2   :  { %s14_s7 = sshll.u32 %s90_s6, 4  ;;  %p43_p0 = scmp.ne.s32.totalorder %s126_s0, %s42_s10  ;;  %s15_s7 = int_to_ptr.vmem [resolvable:$true] %s14_s7 }
   0x3   :  { %p46_p1 = scmp.lt.u32.totalorder %s42_s10, %s126_s0 }
   0x5   :  { %p48_p2 = pnand %p46_p1, %p43_p0 }
   0x7   :  { %51 = shalt.err (!%p48_p2)
}
   0x8   :  { %s52_s15 = scalar_lea.vmem %s15_s7, 256  ;;  %p57_p4 = scmp.lt.s32.totalorder %s15_s7, %s15_s7 }
   0x9   :  { %p53_p3 = scmp.ne.s32.totalorder %s15_s7, %s52_s15  ;;  %p58_p5 = scmp.lt.s32.totalorder %s52_s15, %s52_s15 }
   0xb   :  { %p59_p6 = por %p58_p5, %p57_p4 }
   0xd   :  { %p60_p7 = pnand %p59_p6, %p53_p3 }
   0xf   :  { %63 = shalt.err (!%p60_p7)
}
  0x10   :  { %17 = dma.hbm_to_vmem [thread:$0]  %s126_s0, 256, %s15_s7, [#allocation3]  }
  0x11   :  { %86 = dma.done.wait [#allocation3], 256  }
  0x12   :  { %87 = vsyncadd [#allocation3], 4294967040  ;;  %s91_s18 = smov [#allocation5]   ;;  %v21_v0 = vld [vmem:[#allocation2] sm:$0x77] }
  0x13   :  { %s31_s19 = sshll.u32 %s91_s18, 4  ;;  %v22_v1 = vld [vmem:[#allocation2 + $0x8] sm:$0x77]  ;;  %23 = vst [vmem:[#allocation5] sm:$0x77] %v21_v0  ;;  %s32_s19 = int_to_ptr.vmem [resolvable:$true] %s31_s19 }
  0x14   :  { %24 = vst [vmem:[#allocation5 + $0x8] sm:$0x77] %v22_v1  ;;  %s64_s20 = scalar_lea.vmem %s32_s19, 256  ;;  %p69_p9 = scmp.lt.s32.totalorder %s32_s19, %s32_s19 }
  0x15   :  { %p65_p8 = scmp.ne.s32.totalorder %s32_s19, %s64_s20  ;;  %p70_p10 = scmp.lt.s32.totalorder %s64_s20, %s64_s20 }
  0x17   :  { %p71_p11 = por %p70_p10, %p69_p9 }
  0x19   :  { %p72_p12 = pnand %p71_p11, %p65_p8 }
  0x1b   :  { %75 = shalt.err (!%p72_p12)
}
  0x1c   :  { %s76_s0 = scalar_lea.hbm %s127_s1, 256 }
  0x1d   :  { %p77_p13 = scmp.ne.s32.totalorder %s127_s1, %s76_s0  ;;  %p80_p0 = scmp.lt.u32.totalorder %s76_s0, %s127_s1 }
  0x1f   :  { %p82_p1 = pnand %p80_p0, %p77_p13 }
  0x21   :  { %85 = shalt.err (!%p82_p1)
}
  0x22   :  { %34 = dma.vmem_to_hbm [thread:$0]  %s32_s19, 256, %s127_s1, [#allocation4]  }
  0x23   :  { %88 = dma.done.wait [#allocation4], 256  }
  0x24   :  { %89 = vsyncadd [#allocation4], 4294967040 }
  0x25   :  { %38 = vsyncpa [#allocation3], 1 }
  0x26   :  { %39 = vsyncpa [#allocation4], 1 }

</bundles_post_ra>
